<compile_context>
chip_gen: v7x
topology: tpu7x:2x2x1
jax: 0.10.0
libtpu: 0.0.40
codegen_flags: <defaults>
</compile_context>

<pallas_src>
import functools

import jax
import jax.numpy as jnp
from jax.experimental import pallas as pl
from jax.experimental.pallas import tpu as pltpu


# ---------------------------------------------------------------------------
# Hardware-aware defaults
# ---------------------------------------------------------------------------
def _hw_defaults():
    """Return (block_bytes, vmem_limit_bytes, two_cores)."""
    vmem_cap = 128 << 20
    try:
        vmem_cap = int(pltpu.get_tpu_info().vmem_capacity_bytes)
    except Exception:
        pass
    kind = ""
    try:
        kind = jax.devices()[0].device_kind.lower()
    except Exception:
        pass
    is_v7 = "v7" in kind
    if is_v7 or vmem_cap <= (64 << 20):
        # v7x: 64 MiB physical VMEM, 2 TensorCores.
        block_bytes, vmem_limit = 8 << 20, 56 << 20
    else:
        # v5e / v6e: 128 MiB physical VMEM, 1 TensorCore.
        block_bytes, vmem_limit = 16 << 20, 100 << 20
    return block_bytes, vmem_limit, is_v7


def _choose_bt(batch, per_batch_bytes, block_bytes, two_cores):
    """Largest divisor of `batch` whose x-block fits the byte budget.
    Only split to feed a second TensorCore when one exists and each half
    still moves a meaningful (>= ~2 MiB) slab."""
    cap = max(1, block_bytes // per_batch_bytes)
    if two_cores and batch >= 2:
        half = max(1, batch // 2)
        if half * per_batch_bytes >= (2 << 20):
            cap = min(cap, half)
    bt = 1
    for d in range(1, batch + 1):
        if batch % d == 0 and d <= cap:
            bt = d
    return bt


# ---------------------------------------------------------------------------
# Fused single-pass kernel (per-batch slab fits in VMEM)
# ---------------------------------------------------------------------------
def _fused_mlp_scale(avg, mx, w1_ref, b1_ref, w2_ref, b2_ref):
    """avg, mx: (Bt, C) f32 -> sigmoid(MLP(avg) + MLP(mx)) as (Bt, C) f32.
    The two pooled vectors are stacked so the MLP runs once (half the MXU
    pushes / weight reads)."""
    bt = avg.shape[0]
    pooled = jnp.concatenate([avg, mx], axis=0)                  # (2*Bt, C)
    h = jnp.dot(pooled, w1_ref[...],
                preferred_element_type=jnp.float32) + b1_ref[...]
    h = jnp.maximum(h, 0.0)
    att2 = jnp.dot(h, w2_ref[...],
                   preferred_element_type=jnp.float32) + b2_ref[...]
    att = att2[:bt] + att2[bt:]                                  # (Bt, C)
    return jax.nn.sigmoid(att)


def _channel_att_kernel(x_ref, w1_ref, b1_ref, w2_ref, b2_ref, o_ref, *,
                        inv_hw):
    """x block: (Bt, C, HW), natural layout."""
    x = x_ref[...]                                               # native dtype
    # f32 accumulation for the pools without materializing a full f32 copy.
    avg = jnp.sum(x, axis=-1, dtype=jnp.float32) * jnp.float32(inv_hw)
    mx = jnp.max(x, axis=-1).astype(jnp.float32)                 # (Bt, C)
    scale = _fused_mlp_scale(avg, mx, w1_ref, b1_ref, w2_ref, b2_ref)
    # Scale-apply in the input dtype (bf16 VALU on v6e/v7x; f32 stays f32).
    o_ref[...] = (x * scale.astype(x.dtype)[:, :, None]).astype(o_ref.dtype)


def _channel_att_fused(x3, w1t, b1r, w2t, b2r, *, bt, vmem_limit_bytes):
    B, C, HW = x3.shape
    Cr = w1t.shape[1]
    kernel = functools.partial(_channel_att_kernel, inv_hw=1.0 / HW)
    blk = (bt, C, HW)
    return pl.pallas_call(
        kernel,
        out_shape=jax.ShapeDtypeStruct(x3.shape, x3.dtype),
        grid=(B // bt,),
        in_specs=[
            pl.BlockSpec(blk, lambda i: (i, 0, 0)),
            # Constant index maps: weights/biases DMA'd into VMEM once and
            # reused across all grid steps (block index never changes).
            pl.BlockSpec((C, Cr), lambda i: (0, 0)),             # W1.T
            pl.BlockSpec((1, Cr), lambda i: (0, 0)),             # b1
            pl.BlockSpec((Cr, C), lambda i: (0, 0)),             # W2.T
            pl.BlockSpec((1, C), lambda i: (0, 0)),              # b2
        ],
        out_specs=pl.BlockSpec(blk, lambda i: (i, 0, 0)),
        compiler_params=pltpu.CompilerParams(
            dimension_semantics=("parallel",),
            vmem_limit_bytes=vmem_limit_bytes),
    )(x3, w1t, b1r, w2t, b2r)


# ---------------------------------------------------------------------------
# Spatially-tiled fallback (per-batch slab does NOT fit in VMEM)
# ---------------------------------------------------------------------------
def _pool_kernel(x_ref, avg_ref, mx_ref, sum_acc, max_acc, *, hw, t_hw):
    """Grid (B, n_hw).  Accumulates sum/max over HW tiles in VMEM scratch;
    ragged last tile handled with explicit lane masking."""
    j = pl.program_id(1)

    @pl.when(j == 0)
    def _():
        sum_acc[...] = jnp.zeros_like(sum_acc)
        max_acc[...] = jnp.full_like(max_acc, -jnp.inf)

    x = x_ref[...]                                               # (1, C, t_hw)
    pos = j * t_hw + jax.lax.broadcasted_iota(jnp.int32, (1, 1, t_hw), 2)
    valid = pos < hw
    xs = jnp.where(valid, x, jnp.zeros((), x.dtype))
    xm = jnp.where(valid, x, jnp.array(-jnp.inf, x.dtype))
    sum_acc[...] += jnp.sum(xs, axis=-1, dtype=jnp.float32)      # (1, C)
    max_acc[...] = jnp.maximum(max_acc[...],
                               jnp.max(xm, axis=-1).astype(jnp.float32))

    @pl.when(j == pl.num_programs(1) - 1)
    def _():
        avg_ref[...] = (sum_acc[...] * jnp.float32(1.0 / hw))[:, :, None]
        mx_ref[...] = max_acc[...][:, :, None]


def _scale_kernel(x_ref, s_ref, o_ref):
    """x block (1, C, t_hw), scale block (1, C, 1)."""
    o_ref[...] = (x_ref[...] * s_ref[...]).astype(o_ref.dtype)


def _channel_att_tiled(x3, w1t, b1r, w2t, b2r, *, block_bytes,
                       vmem_limit_bytes):
    B, C, HW = x3.shape
    itemsize = jnp.dtype(x3.dtype).itemsize

    # Lane-tile size: multiple of 128 (or the full HW when HW <= 128).
    lane_budget = max(128, (block_bytes // max(1, C * itemsize)) // 128 * 128)
    if HW <= 128:
        t_hw = HW
    elif HW % 128 == 0:
        t_hw = min(lane_budget, HW)
    else:
        t_hw = min(lane_budget, (HW // 128) * 128)
    n_hw = pl.cdiv(HW, t_hw)

    pool_kernel = functools.partial(_pool_kernel, hw=HW, t_hw=t_hw)
    avg, mx = pl.pallas_call(
        pool_kernel,
        out_shape=(jax.ShapeDtypeStruct((B, C, 1), jnp.float32),
                   jax.ShapeDtypeStruct((B, C, 1), jnp.float32)),
        grid=(B, n_hw),
        in_specs=[pl.BlockSpec((1, C, t_hw), lambda b, j: (b, 0, j))],
        out_specs=(pl.BlockSpec((1, C, 1), lambda b, j: (b, 0, 0)),
                   pl.BlockSpec((1, C, 1), lambda b, j: (b, 0, 0))),
        scratch_shapes=[pltpu.VMEM((1, C), jnp.float32),
                        pltpu.VMEM((1, C), jnp.float32)],
        compiler_params=pltpu.CompilerParams(
            dimension_semantics=("parallel", "arbitrary"),
            vmem_limit_bytes=vmem_limit_bytes),
    )(x3)

    # Tiny MLP (O(B*C^2/r)) in plain XLA -- far off the HBM-bound critical path.
    avg2 = avg[:, :, 0]
    mx2 = mx[:, :, 0]
    pooled = jnp.concatenate([avg2, mx2], axis=0)                # (2B, C) f32
    h = jnp.maximum(pooled @ w1t.astype(jnp.float32) + b1r, 0.0)
    att2 = h @ w2t.astype(jnp.float32) + b2r
    scale = jax.nn.sigmoid(att2[:B] + att2[B:]).astype(x3.dtype)  # (B, C)
    scale = scale[:, :, None]                                     # (B, C, 1)

    return pl.pallas_call(
        _scale_kernel,
        out_shape=jax.ShapeDtypeStruct(x3.shape, x3.dtype),
        grid=(B, n_hw),
        in_specs=[pl.BlockSpec((1, C, t_hw), lambda b, j: (b, 0, j)),
                  pl.BlockSpec((1, C, 1), lambda b, j: (b, 0, 0))],
        out_specs=pl.BlockSpec((1, C, t_hw), lambda b, j: (b, 0, j)),
        compiler_params=pltpu.CompilerParams(
            dimension_semantics=("parallel", "arbitrary"),
            vmem_limit_bytes=vmem_limit_bytes),
    )(x3, scale)


# ---------------------------------------------------------------------------
# Wrapper
# ---------------------------------------------------------------------------
def channel_att(x, w1, b1, w2, b2, *, block_bytes=None, vmem_limit_bytes=None):
    """x: (B, C, H, W). w1: (C_r, C), b1: (C_r,), w2: (C, C_r), b2: (C,)
    (PyTorch nn.Linear weight layout: (out_features, in_features))."""
    B, C, H, W = x.shape
    HW = H * W
    Cr = w1.shape[0]

    auto_block, auto_vmem, two_cores = _hw_defaults()
    block_bytes = block_bytes or auto_block
    vmem_limit_bytes = vmem_limit_bytes or auto_vmem

    # PyTorch Linear computes y = v @ W.T + b -> pass transposed weights.
    w1t = jnp.asarray(w1.T)                                      # (C, Cr)
    w2t = jnp.asarray(w2.T)                                      # (Cr, C)
    b1r = b1.reshape(1, Cr)
    b2r = b2.reshape(1, C)

    itemsize = jnp.dtype(x.dtype).itemsize
    per_batch_bytes = C * HW * itemsize
    x3 = x.reshape(B, C, HW)                                     # natural layout

    if per_batch_bytes <= block_bytes:
        bt = _choose_bt(B, per_batch_bytes, block_bytes, two_cores)
        out3 = _channel_att_fused(x3, w1t, b1r, w2t, b2r, bt=bt,
                                  vmem_limit_bytes=vmem_limit_bytes)
    else:
        # Per-batch slab too big for VMEM: spatially tiled two-pass fallback.
        out3 = _channel_att_tiled(x3, w1t, b1r, w2t, b2r,
                                  block_bytes=block_bytes,
                                  vmem_limit_bytes=vmem_limit_bytes)
    return out3.reshape(B, C, H, W)


# ---------------------------------------------------------------------------
# Pure-JAX reference (mirrors the PyTorch forward)
# ---------------------------------------------------------------------------
def channel_att_reference(x, w1, b1, w2, b2):
    def mlp(v):  # v: (B, C)
        h = jnp.maximum(v @ w1.T + b1, 0.0)
        return h @ w2.T + b2

    avg = jnp.mean(x, axis=(2, 3))
    mx = jnp.max(x, axis=(2, 3))
    att = mlp(avg) + mlp(mx)
    scale = jax.nn.sigmoid(att)[:, :, None, None]
    return x * scale


# ---------------------------------------------------------------------------
# Demo / correctness check
# ---------------------------------------------------------------------------
def _run_case(key, B, C, H, W, reduction_ratio=16, block_bytes=None):
    Cr = C // reduction_ratio
    kx, k1, k2, k3, k4 = jax.random.split(key, 5)
    x = jax.random.normal(kx, (B, C, H, W), dtype=jnp.float32)
    w1 = jax.random.normal(k1, (Cr, C), dtype=jnp.float32) * 0.1
    b1 = jax.random.normal(k2, (Cr,), dtype=jnp.float32) * 0.1
    w2 = jax.random.normal(k3, (C, Cr), dtype=jnp.float32) * 0.1
    b2 = jax.random.normal(k4, (C,), dtype=jnp.float32) * 0.1

    out = jax.block_until_ready(
        channel_att(x, w1, b1, w2, b2, block_bytes=block_bytes))
    ref = channel_att_reference(x, w1, b1, w2, b2)
    assert out.shape == (B, C, H, W)
    assert jnp.allclose(out, ref, atol=1e-5, rtol=1e-5), \
        f"mismatch vs reference for shape {(B, C, H, W)}"


if __name__ == "__main__":
    key = jax.random.PRNGKey(0)
    k_a, k_b, k_c, k_d = jax.random.split(key, 4)

    # Case 1: fused path, HW = 256 (lane-dense stores).
    _run_case(k_a, B=2, C=64, H=16, W=16)

    # Case 2: fused path, HW = 49 (masked partial stores, no transpose).
    _run_case(k_b, B=2, C=128, H=7, W=7)

    # Case 3: forced spatially-tiled fallback (HW multiple of the lane tile).
    _run_case(k_c, B=2, C=64, H=16, W=16, block_bytes=32 << 10)

    # Case 4: forced fallback with a ragged last HW tile (HW = 400, t_hw = 128).
    _run_case(k_d, B=2, C=64, H=20, W=20, block_bytes=48 << 10)

    print("KERNEL_OK")
</pallas_src>

<mosaic_0001>
module attributes {stable_mosaic.version = 11 : i64} {
  func.func @_channel_att_kernel(%arg0: i32, %arg1: memref<2x64x256xf32, #tpu.memory_space<vmem>>, %arg2: memref<64x4xf32, #tpu.memory_space<vmem>>, %arg3: memref<1x4xf32, #tpu.memory_space<vmem>>, %arg4: memref<4x64xf32, #tpu.memory_space<vmem>>, %arg5: memref<1x64xf32, #tpu.memory_space<vmem>>, %arg6: memref<2x64x256xf32, #tpu.memory_space<vmem>>) attributes {dimension_semantics = [#tpu.dimension_semantics<parallel>], iteration_bounds = array<i64: 1>, scalar_prefetch = 0 : i64, scratch_operands = 0 : i64, tpu.core_type = #tpu.core_type<tc>, window_params = [{transform_indices = @transform_0, window_bounds = array<i64: 2, 64, 256>}, {pipeline_mode = #tpu.pipeline_mode<synchronous>, transform_indices = @transform_1, window_bounds = array<i64: 64, 4>}, {pipeline_mode = #tpu.pipeline_mode<synchronous>, transform_indices = @transform_2, window_bounds = array<i64: 1, 4>}, {pipeline_mode = #tpu.pipeline_mode<synchronous>, transform_indices = @transform_3, window_bounds = array<i64: 4, 64>}, {pipeline_mode = #tpu.pipeline_mode<synchronous>, transform_indices = @transform_4, window_bounds = array<i64: 1, 64>}, {transform_indices = @transform_5, window_bounds = array<i64: 2, 64, 256>}]} {
    %c0 = arith.constant 0 : index
    %c0_0 = arith.constant 0 : index
    %c0_1 = arith.constant 0 : index
    %0 = vector.load %arg1[%c0, %c0_0, %c0_1] : memref<2x64x256xf32, #tpu.memory_space<vmem>>, vector<2x64x256xf32>
    %cst = arith.constant dense<0.000000e+00> : vector<2x64xf32>
    %1 = vector.multi_reduction <add>, %0, %cst [2] : vector<2x64x256xf32> to vector<2x64xf32>
    %cst_2 = arith.constant 3.906250e-03 : f32
    %2 = vector.broadcast %cst_2 : f32 to vector<2x64xf32>
    %3 = arith.mulf %1, %2 : vector<2x64xf32>
    %cst_3 = arith.constant dense<0xFF800000> : vector<2x64xf32>
    %4 = vector.multi_reduction <maximumf>, %0, %cst_3 [2] : vector<2x64x256xf32> to vector<2x64xf32>
    %5 = tpu.concatenate %3, %4 in 0 : vector<2x64xf32>, vector<2x64xf32> -> vector<4x64xf32>
    %c0_4 = arith.constant 0 : index
    %c0_5 = arith.constant 0 : index
    %6 = vector.load %arg2[%c0_4, %c0_5] : memref<64x4xf32, #tpu.memory_space<vmem>>, vector<64x4xf32>
    %cst_6 = arith.constant dense<0.000000e+00> : vector<4x4xf32>
    %7 = tpu.matmul %5, %6, %cst_6 {dimension_numbers = #tpu.dot_dimension_numbers<[1], [0], [0], [1], [0, 0, 1, 1], [], []>} : vector<4x64xf32>, vector<64x4xf32>, vector<4x4xf32> -> vector<4x4xf32>
    %c0_7 = arith.constant 0 : index
    %c0_8 = arith.constant 0 : index
    %8 = vector.load %arg3[%c0_7, %c0_8] : memref<1x4xf32, #tpu.memory_space<vmem>>, vector<1x4xf32>
    %9 = vector.broadcast %8 : vector<1x4xf32> to vector<4x4xf32>
    %10 = arith.addf %7, %9 : vector<4x4xf32>
    %cst_9 = arith.constant 0.000000e+00 : f32
    %11 = vector.broadcast %cst_9 : f32 to vector<4x4xf32>
    %12 = arith.maximumf %10, %11 : vector<4x4xf32>
    %c0_10 = arith.constant 0 : index
    %c0_11 = arith.constant 0 : index
    %13 = vector.load %arg4[%c0_10, %c0_11] : memref<4x64xf32, #tpu.memory_space<vmem>>, vector<4x64xf32>
    %cst_12 = arith.constant dense<0.000000e+00> : vector<4x64xf32>
    %14 = tpu.matmul %12, %13, %cst_12 {dimension_numbers = #tpu.dot_dimension_numbers<[1], [0], [0], [1], [0, 0, 1, 1], [], []>} : vector<4x4xf32>, vector<4x64xf32>, vector<4x64xf32> -> vector<4x64xf32>
    %c0_13 = arith.constant 0 : index
    %c0_14 = arith.constant 0 : index
    %15 = vector.load %arg5[%c0_13, %c0_14] : memref<1x64xf32, #tpu.memory_space<vmem>>, vector<1x64xf32>
    %16 = vector.broadcast %15 : vector<1x64xf32> to vector<4x64xf32>
    %17 = arith.addf %14, %16 : vector<4x64xf32>
    %18 = vector.extract_strided_slice %17 {offsets = [0, 0], sizes = [2, 64], strides = [1, 1]} : vector<4x64xf32> to vector<2x64xf32>
    %19 = vector.extract_strided_slice %17 {offsets = [2, 0], sizes = [2, 64], strides = [1, 1]} : vector<4x64xf32> to vector<2x64xf32>
    %20 = arith.addf %18, %19 : vector<2x64xf32>
    %21 = arith.negf %20 : vector<2x64xf32>
    %22 = math.exp %21 : vector<2x64xf32>
    %cst_15 = arith.constant 1.000000e+00 : f32
    %23 = vector.broadcast %cst_15 : f32 to vector<2x64xf32>
    %24 = arith.addf %23, %22 : vector<2x64xf32>
    %25 = arith.divf %23, %24 : vector<2x64xf32>
    %26 = vector.shape_cast %25 : vector<2x64xf32> to vector<2x64x1xf32>
    %27 = vector.broadcast %26 : vector<2x64x1xf32> to vector<2x64x256xf32>
    %28 = arith.mulf %0, %27 : vector<2x64x256xf32>
    %c0_16 = arith.constant 0 : index
    %c0_17 = arith.constant 0 : index
    %c0_18 = arith.constant 0 : index
    %29 = vector.load %arg6[%c0_16, %c0_17, %c0_18] : memref<2x64x256xf32, #tpu.memory_space<vmem>>, vector<2x64x256xf32>
    tpu.vector_store %arg6[%c0_16, %c0_17, %c0_18], %28 {strides = array<i32>} : memref<2x64x256xf32, #tpu.memory_space<vmem>>, vector<2x64x256xf32>,
    return
  }
  func.func @transform_0(%arg0: i32) -> (i32, i32, i32) {
    %c0_i32 = arith.constant 0 : i32
    %c0_i32_0 = arith.constant 0 : i32
    %c0_i32_1 = arith.constant 0 : i32
    return %arg0, %c0_i32, %c0_i32_0 : i32, i32, i32
  }
  func.func @transform_1(%arg0: i32) -> (i32, i32) {
    %c0_i32 = arith.constant 0 : i32
    %c0_i32_0 = arith.constant 0 : i32
    %c0_i32_1 = arith.constant 0 : i32
    return %c0_i32, %c0_i32_0 : i32, i32
  }
  func.func @transform_2(%arg0: i32) -> (i32, i32) {
    %c0_i32 = arith.constant 0 : i32
    %c0_i32_0 = arith.constant 0 : i32
    %c0_i32_1 = arith.constant 0 : i32
    return %c0_i32, %c0_i32_0 : i32, i32
  }
  func.func @transform_3(%arg0: i32) -> (i32, i32) {
    %c0_i32 = arith.constant 0 : i32
    %c0_i32_0 = arith.constant 0 : i32
    %c0_i32_1 = arith.constant 0 : i32
    return %c0_i32, %c0_i32_0 : i32, i32
  }
  func.func @transform_4(%arg0: i32) -> (i32, i32) {
    %c0_i32 = arith.constant 0 : i32
    %c0_i32_0 = arith.constant 0 : i32
    %c0_i32_1 = arith.constant 0 : i32
    return %c0_i32, %c0_i32_0 : i32, i32
  }
  func.func @transform_5(%arg0: i32) -> (i32, i32, i32) {
    %c0_i32 = arith.constant 0 : i32
    %c0_i32_0 = arith.constant 0 : i32
    %c0_i32_1 = arith.constant 0 : i32
    return %arg0, %c0_i32, %c0_i32_0 : i32, i32, i32
  }
}

</mosaic_0001>

<bundles_post_ra>
// kernel: tpu_custom_call.1
= control target key start
LH: loop header
LB: loop body
LE: loop exit
PB: predicated region body
PF: predicated region fallthrough
CT: control target
= control target key end

     0   :  { %10 = vsyncpa [#allocation3], 0  ;;  %s1389_s0 = inlined_call_operand.hbm [shape: f32[2,64,256], index: 0, kind: input, shape index: {}]   ;;  %s1390_s1 = inlined_call_operand.hbm [shape: f32[64,4], index: 1, kind: input, shape index: {}]   ;;  %s1391_s2 = inlined_call_operand.hbm [shape: f32[1,4], index: 2, kind: input, shape index: {}]   ;;  %s1392_s3 = inlined_call_operand.hbm [shape: f32[4,64], index: 3, kind: input, shape index: {}]   ;;  %s1393_s4 = inlined_call_operand.hbm [shape: f32[1,64], index: 4, kind: input, shape index: {}]   ;;  %s1394_s5 = inlined_call_operand.hbm [shape: f32[2,64,256], index: 5, kind: output, shape index: {}]  }
   0x1   :  { %11 = vsyncpa [#allocation6], 0 }
   0x2   :  { %12 = vsyncpa [#allocation9], 0 }
   0x3   :  { %13 = vsyncpa [#allocation4], 0  ;;  %s988_s18 = smov [#allocation5]   ;;  %s848_s22 = scalar_lea.hbm %s1390_s1, 1024 }
   0x4   :  { %s31_s19 = sshll.u32 %s988_s18, 4  ;;  %p849_p0 = scmp.ne.s32.totalorder %s1390_s1, %s848_s22  ;;  %s32_s19 = int_to_ptr.vmem [resolvable:$true] %s31_s19 }
   0x5   :  { %p852_p1 = scmp.lt.u32.totalorder %s848_s22, %s1390_s1 }
   0x7   :  { %p854_p2 = pnand %p852_p1, %p849_p0 }
   0x9   :  { %857 = shalt.err (!%p854_p2)
}
   0xa   :  { %s858_s27 = scalar_lea.vmem %s32_s19, 1024  ;;  %p863_p4 = scmp.lt.s32.totalorder %s32_s19, %s32_s19 }
   0xb   :  { %p859_p3 = scmp.ne.s32.totalorder %s32_s19, %s858_s27  ;;  %p864_p5 = scmp.lt.s32.totalorder %s858_s27, %s858_s27 }
   0xd   :  { %p865_p6 = por %p864_p5, %p863_p4 }
   0xf   :  { %p866_p7 = pnand %p865_p6, %p859_p3 }
  0x11   :  { %869 = shalt.err (!%p866_p7)
}
  0x12   :  { %s989_s28 = smov 128   ;;  %s990_s29 = smov 8  }
  0x13   :  { %37 = dma.hbm_to_vmem [thread:$0]  %s1390_s1, 1024, %s32_s19, [#allocation6], %s989_s28, %s989_s28, %s990_s29  }
  0x14   :  { %s991_s7 = smov [#allocation8]   ;;  %s992_s9 = smov [#allocation2]  }
  0x15   :  { %s54_s8 = sshll.u32 %s991_s7, 4  ;;  %s19_s10 = sshll.u32 %s992_s9, 4  ;;  %s55_s8 = int_to_ptr.vmem [resolvable:$true] %s54_s8  ;;  %s20_s10 = int_to_ptr.vmem [resolvable:$true] %s19_s10 }
  0x16   :  { %s870_s13 = scalar_lea.hbm %s1392_s3, 64 }
  0x17   :  { %p871_p8 = scmp.ne.s32.totalorder %s1392_s3, %s870_s13  ;;  %p874_p9 = scmp.lt.u32.totalorder %s870_s13, %s1392_s3 }
  0x19   :  { %p876_p10 = pnand %p874_p9, %p871_p8 }
  0x1b   :  { %879 = shalt.err (!%p876_p10)
}
  0x1c   :  { %s880_s1 = scalar_lea.vmem %s55_s8, 64  ;;  %p885_p12 = scmp.lt.s32.totalorder %s55_s8, %s55_s8 }
  0x1d   :  { %p881_p11 = scmp.ne.s32.totalorder %s55_s8, %s880_s1  ;;  %p886_p13 = scmp.lt.s32.totalorder %s880_s1, %s880_s1 }
  0x1f   :  { %p887_p0 = por %p886_p13, %p885_p12 }
  0x21   :  { %p888_p1 = pnand %p887_p0, %p881_p11 }
  0x23   :  { %891 = shalt.err (!%p888_p1)
}
  0x24   :  { %57 = dma.hbm_to_vmem [thread:$0]  %s1392_s3, 64, %s55_s8, [#allocation9]  }
  0x25   :  { %s892_s22 = scalar_lea.hbm %s1389_s0, 4096 }
  0x26   :  { %p893_p2 = scmp.ne.s32.totalorder %s1389_s0, %s892_s22  ;;  %p896_p3 = scmp.lt.u32.totalorder %s892_s22, %s1389_s0 }
  0x28   :  { %p898_p4 = pnand %p896_p3, %p893_p2 }
  0x2a   :  { %901 = shalt.err (!%p898_p4)
}
  0x2b   :  { %s902_s27 = scalar_lea.vmem %s20_s10, 4096  ;;  %p907_p6 = scmp.lt.s32.totalorder %s20_s10, %s20_s10 }
  0x2c   :  { %p903_p5 = scmp.ne.s32.totalorder %s20_s10, %s902_s27  ;;  %p908_p7 = scmp.lt.s32.totalorder %s902_s27, %s902_s27 }
  0x2e   :  { %p909_p8 = por %p908_p7, %p907_p6 }
  0x30   :  { %p910_p9 = pnand %p909_p8, %p903_p5 }
  0x32   :  { %913 = shalt.err (!%p910_p9)
}
  0x33   :  { %s993_s3 = smov 256   ;;  %s994_s28 = smov 16  }
  0x34   :  { %25 = dma.hbm_to_vmem [thread:$0]  %s1389_s0, 4096, %s20_s10, [#allocation3], %s993_s3, %s993_s3, %s994_s28  }
  0x35   :  { %s995_s6 = smov [#allocation7]   ;;  %s996_s8 = smov [#allocation10]  }
  0x36   :  { %s44_s7 = sshll.u32 %s995_s6, 4  ;;  %s64_s9 = sshll.u32 %s996_s8, 4  ;;  %s45_s7 = int_to_ptr.vmem [resolvable:$true] %s44_s7  ;;  %s65_s9 = int_to_ptr.vmem [resolvable:$true] %s64_s9 }
  0x37   :  { %s914_s13 = scalar_lea.hbm %s1391_s2, 16 }
  0x38   :  { %p915_p10 = scmp.ne.s32.totalorder %s1391_s2, %s914_s13  ;;  %p918_p11 = scmp.lt.u32.totalorder %s914_s13, %s1391_s2 }
  0x3a   :  { %p920_p12 = pnand %p918_p11, %p915_p10 }
  0x3c   :  { %923 = shalt.err (!%p920_p12)
}
  0x3d   :  { %s924_s0 = scalar_lea.vmem %s45_s7, 16  ;;  %s928_s10 = scalar_lea.vmem %s45_s7, 32 }
  0x3e   :  { %p925_p13 = scmp.ne.s32.totalorder %s45_s7, %s924_s0  ;;  %p929_p0 = scmp.lt.s32.totalorder %s45_s7, %s45_s7 }
  0x3f   :  { %p930_p1 = scmp.lt.s32.totalorder %s928_s10, %s924_s0 }
  0x41   :  { %p931_p2 = por %p930_p1, %p929_p0 }
  0x43   :  { %p932_p3 = pnand %p931_p2, %p925_p13 }
  0x45   :  { %935 = shalt.err (!%p932_p3)
}
  0x46   :  { %47 = dma.hbm_to_vmem [thread:$0]  %s1391_s2, 16, %s45_s7, [#allocation6]  }
  0x47   :  { %s936_s21 = scalar_lea.hbm %s1393_s4, 16 }
  0x48   :  { %p937_p4 = scmp.ne.s32.totalorder %s1393_s4, %s936_s21  ;;  %p940_p5 = scmp.lt.u32.totalorder %s936_s21, %s1393_s4 }
  0x4a   :  { %p942_p6 = pnand %p940_p5, %p937_p4 }
  0x4c   :  { %945 = shalt.err (!%p942_p6)
}
  0x4d   :  { %s946_s26 = scalar_lea.vmem %s65_s9, 16  ;;  %s950_s27 = scalar_lea.vmem %s65_s9, 32 }
  0x4e   :  { %p947_p7 = scmp.ne.s32.totalorder %s65_s9, %s946_s26  ;;  %p951_p8 = scmp.lt.s32.totalorder %s65_s9, %s65_s9 }
  0x4f   :  { %p952_p9 = scmp.lt.s32.totalorder %s950_s27, %s946_s26 }
  0x51   :  { %p953_p10 = por %p952_p9, %p951_p8 }
  0x53   :  { %p954_p11 = pnand %p953_p10, %p947_p7 }
  0x55   :  { %957 = shalt.err (!%p954_p11)
}
  0x56   :  { %67 = dma.hbm_to_vmem [thread:$0]  %s1393_s4, 16, %s65_s9, [#allocation9]  }
  0x57   :  { %980 = dma.done.wait [#allocation3], 4096  }
  0x58   :  { %981 = vsyncadd [#allocation3], 4294963200 }
  0x59   :  { %982 = dma.done.wait [#allocation6], 1040  }
  0x5a   :  { %983 = vsyncadd [#allocation6], 4294966256 }
  0x5b   :  { %984 = dma.done.wait [#allocation9], 80  }
  0x5c   :  { %985 = vsyncadd [#allocation9], 4294967216  ;;  %v1094_v0 = vld [vmem:[#allocation2 + $0x80] sm:$0xff]  ;;  %v1096_v1 = vld [vmem:[#allocation2 + $0x88] sm:$0xff]  ;;  %vm998_vm0 = vmmov 0   ;;  %vm254_vm1 = vcmask 130112  }
  0x5d   :  { %v1098_v2 = vld [vmem:[#allocation2] sm:$0xff]  ;;  %v139_v3 = vadd.f32 %v1096_v1, %v1094_v0  ;;  %v1102_v4 = vld [vmem:[#allocation2 + $0x8] sm:$0xff]  ;;  %v1104_v5 = vld [vmem:[#allocation2 + $0x90] sm:$0xff]  ;;  %v203_v27 = vmax.f32 %v1094_v0, %v1096_v1  ;;  %vm261_vm2 = vcmask 195712   ;;  %vm268_vm3 = vcmask 261312   ;;  %s1000_s4 = smov [#allocation11]  }
  0x5e   :  { %1408 = vst [vmem:[#allocation16_spill] sm:$0xff] %v1104_v5  ;;  %v1106_v6 = vld [vmem:[#allocation2 + $0x98] sm:$0xff]  ;;  %v115_v7 = vadd.f32 %v1102_v4, %v1098_v2  ;;  %v1110_v8 = vld [vmem:[#allocation2 + $0x10] sm:$0xff]  ;;  %v1118_v12 = vld [vmem:[#allocation2 + $0xa0] sm:$0xff]  ;;  %v179_v25 = vmax.f32 %v1098_v2, %v1102_v4  ;;  %vm275_vm4 = vcmask 326912   ;;  %vm282_vm5 = vcmask 392512  }
  0x5f   :  { %1409 = vst [vmem:[#allocation17_spill] sm:$0xff] %v1106_v6  ;;  %v1112_v9 = vld [vmem:[#allocation2 + $0x18] sm:$0xff]  ;;  %140 = vadd.xlane.f32.xlu1 %v139_v3  ;;  %v142_v10 = vadd.f32 %v1106_v6, %v1104_v5  ;;  %v1120_v13 = vld [vmem:[#allocation2 + $0xa8] sm:$0xff]  ;;  %v1122_v14 = vld [vmem:[#allocation2 + $0x20] sm:$0xff]  ;;  %v206_v26 = vmax.f32 %v1104_v5, %v1106_v6  ;;  %vm289_vm6 = vcmask 458112   ;;  %vm296_vm7 = vcmask 523712  }
  0x60   :  { %116 = vadd.xlane.f32.xlu0 %v115_v7  ;;  %v118_v11 = vadd.f32 %v1112_v9, %v1110_v8  ;;  %1410 = vst [vmem:[#allocation18_spill] sm:$0xff] %v1120_v13  ;;  %v1124_v15 = vld [vmem:[#allocation2 + $0x28] sm:$0xff]  ;;  %v145_v16 = vadd.f32 %v1120_v13, %v1118_v12  ;;  %v1130_v18 = vld [vmem:[#allocation2 + $0xb0] sm:$0xff]  ;;  %v1132_v19 = vld [vmem:[#allocation2 + $0xb8] sm:$0xff]  ;;  %v182_v24 = vmax.f32 %v1110_v8, %v1112_v9  ;;  %vm337_vm8 = vcmask 1041409   ;;  %s764_s30 = sshll.u32 %s1000_s4, 4  ;;  %s765_s30 = int_to_ptr.vmem [resolvable:$true] %s764_s30 }
  0x61   :  { %v121_v17 = vadd.f32 %v1124_v15, %v1122_v14  ;;  %1411 = vst [vmem:[#allocation19_spill] sm:$0xff] %v1130_v18  ;;  %1412 = vst [vmem:[#allocation20_spill] sm:$0xff] %v1132_v19  ;;  %v1134_v20 = vld [vmem:[#allocation2 + $0x30] sm:$0xff]  ;;  %v1136_v21 = vld [vmem:[#allocation2 + $0x38] sm:$0xff]  ;;  %v148_v22 = vadd.f32 %v1132_v19, %v1130_v18  ;;  %v209_v34 = vmax.f32 %v1118_v12, %v1120_v13  ;;  %vm434_vm9 = vcmask 1043459   ;;  %s958_s6 = scalar_lea.vmem %s765_s30, 4096  ;;  %p963_p13 = scmp.lt.s32.totalorder %s765_s30, %s765_s30 }
  0x62   :  { %v124_v23 = vadd.f32 %v1136_v21, %v1134_v20  ;;  %v1150_v28 = vld [vmem:[#allocation2 + $0xc0] sm:$0xff]  ;;  %v1152_v29 = vld [vmem:[#allocation2 + $0xc8] sm:$0xff]  ;;  %v185_v35 = vmax.f32 %v1122_v14, %v1124_v15  ;;  %v1166_v36 = vld [vmem:[#allocation2 + $0xd0] sm:$0xff]  ;;  %v212_v42 = vmax.f32 %v1130_v18, %v1132_v19  ;;  %v188_v43 = vmax.f32 %v1134_v20, %v1136_v21  ;;  %p959_p12 = scmp.ne.s32.totalorder %s765_s30, %s958_s6  ;;  %p964_p0 = scmp.lt.s32.totalorder %s958_s6, %s958_s6 }
  0x63   :  { %143 = vadd.xlane.f32.xlu1 %v142_v10  ;;  %1413 = vst [vmem:[#allocation21_spill] sm:$0xff] %v1150_v28  ;;  %1414 = vst [vmem:[#allocation22_spill] sm:$0xff] %v1152_v29  ;;  %v1154_v30 = vld [vmem:[#allocation2 + $0x40] sm:$0xff]  ;;  %v1156_v31 = vld [vmem:[#allocation2 + $0x48] sm:$0xff]  ;;  %v151_v32 = vadd.f32 %v1152_v29, %v1150_v28  ;;  %v215_v50 = vmax.f32 %v1150_v28, %v1152_v29  ;;  %vm437_vm10 = vcmask 1041408   ;;  %vm454_vm11 = vcmask 523264  }
  0x64   :  { %119 = vadd.xlane.f32.xlu0 %v118_v11  ;;  %v127_v33 = vadd.f32 %v1156_v31, %v1154_v30  ;;  %1415 = vst [vmem:[#allocation23_spill] sm:$0xff] %v1166_v36  ;;  %v1168_v37 = vld [vmem:[#allocation2 + $0xd8] sm:$0xff]  ;;  %v1170_v38 = vld [vmem:[#allocation2 + $0x50] sm:$0xff]  ;;  %v1182_v44 = vld [vmem:[#allocation2 + $0xe0] sm:$0xff]  ;;  %v191_v51 = vmax.f32 %v1154_v30, %v1156_v31  ;;  %v997_v11 = vmov 0.0|0.0   ;;  %vm541_vm12 = vcmask 1043456   ;;  %p965_p1 = por %p964_p0, %p963_p13 }
  0x65   :  { %1416 = vst [vmem:[#allocation24_spill] sm:$0xff] %v1168_v37  ;;  %v1172_v39 = vld [vmem:[#allocation2 + $0x58] sm:$0xff]  ;;  %v154_v40 = vadd.f32 %v1168_v37, %v1166_v36  ;;  %1417 = vst [vmem:[#allocation25_spill] sm:$0xff] %v1182_v44  ;;  %v1184_v45 = vld [vmem:[#allocation2 + $0xe8] sm:$0xff]  ;;  %v218_v58 = vmax.f32 %v1166_v36, %v1168_v37  ;;  %819 = vmatprep.subr.bf16.mxu0 %v997_v11  ;;  %vm537_vm13 = vcmask 31744  }
  0x66   :  { %v130_v41 = vadd.f32 %v1172_v39, %v1170_v38  ;;  %1418 = vst [vmem:[#allocation26_spill] sm:$0xff] %v1184_v45  ;;  %v1186_v46 = vld [vmem:[#allocation2 + $0x60] sm:$0xff]  ;;  %v1188_v47 = vld [vmem:[#allocation2 + $0x68] sm:$0xff]  ;;  %v157_v48 = vadd.f32 %v1184_v45, %v1182_v44  ;;  %v1198_v52 = vld [vmem:[#allocation2 + $0xf0] sm:$0xff]  ;;  %v194_v59 = vmax.f32 %v1170_v38, %v1172_v39  ;;  %v221_v60 = vmax.f32 %v1182_v44, %v1184_v45  ;;  %p966_p2 = pnand %p965_p1, %p959_p12 }
  0x67   :  { %146 = vadd.xlane.f32.xlu1 %v145_v16  ;;  %v133_v49 = vadd.f32 %v1188_v47, %v1186_v46  ;;  %1419 = vst [vmem:[#allocation27_spill] sm:$0xff] %v1198_v52  ;;  %v1200_v53 = vld [vmem:[#allocation2 + $0xf8] sm:$0xff]  ;;  %v1202_v54 = vld [vmem:[#allocation2 + $0x70] sm:$0xff]  ;;  %v197_v61 = vmax.f32 %v1186_v46, %v1188_v47  ;;  %v439_v3 = vld [vmem:[#allocation5] sm:$0xff] }
  0x68   :  { %122 = vadd.xlane.f32.xlu0 %v121_v17  ;;  %1420 = vst [vmem:[#allocation28_spill] sm:$0xff] %v1200_v53  ;;  %v1204_v55 = vld [vmem:[#allocation2 + $0x78] sm:$0xff]  ;;  %v160_v56 = vadd.f32 %v1200_v53, %v1198_v52  ;;  %v224_v62 = vmax.f32 %v1198_v52, %v1200_v53  ;;  %v440_v7 = vld [vmem:[#allocation5 + $0x8] sm:$0xff]  ;;  %v441_v16 = vld [vmem:[#allocation5 + $0x10] sm:$0xff] }
  0x69   :  { %v136_v57 = vadd.f32 %v1204_v55, %v1202_v54  ;;  %v200_v63 = vmax.f32 %v1202_v54, %v1204_v55  ;;  %v820_v10 = vpack.c.bf16 %v440_v7, %v439_v3  ;;  %v442_v17 = vld [vmem:[#allocation5 + $0x18] sm:$0xff] }
  0x6b   :  { %149 = vadd.xlane.f32.xlu1 %v148_v22  ;;  %821 = vmatpush3.bf16.msra.mxu0 %v820_v10  ;;  %v823_v22 = vpack.c.bf16 %v442_v17, %v441_v16 }
  0x6c   :  { %125 = vadd.xlane.f32.xlu0 %v124_v23  ;;  %822 = vmatprep.subr.bf16.mxu0 %v997_v11  ;;  %v443_v23 = vld [vmem:[#allocation5 + $0x20] sm:$0xff] }
  0x6f   :  { %183 = vmax.xlane.f32.xlu1 %v182_v24  ;;  %824 = vmatpush3.bf16.msra.mxu0 %v823_v22  ;;  %v444_v24 = vld [vmem:[#allocation5 + $0x28] sm:$0xff] }
  0x70   :  { %180 = vmax.xlane.f32.xlu0 %v179_v25  ;;  %825 = vmatprep.subr.bf16.mxu0 %v997_v11  ;;  %v826_v25 = vpack.c.bf16 %v444_v24, %v443_v23 }
  0x73   :  { %207 = vmax.xlane.f32.xlu1 %v206_v26  ;;  %827 = vmatpush3.bf16.msra.mxu0 %v826_v25  ;;  %v445_v26 = vld [vmem:[#allocation5 + $0x30] sm:$0xff] }
  0x74   :  { %204 = vmax.xlane.f32.xlu0 %v203_v27  ;;  %828 = vmatprep.subr.bf16.mxu0 %v997_v11  ;;  %v446_v27 = vld [vmem:[#allocation5 + $0x38] sm:$0xff] }
  0x77   :  { %152 = vadd.xlane.f32.xlu1 %v151_v32  ;;  %v829_v32 = vpack.c.bf16 %v446_v27, %v445_v26 }
  0x78   :  { %128 = vadd.xlane.f32.xlu0 %v127_v33  ;;  %v999_v33 = vmov 0.0  }
  0x79   :  { %830 = vmatpush3.bf16.msra.mxu0 %v829_v32  ;;  %811 = vmatprep.mubr.msk.f32.mxu0 %vm998_vm0, %v999_v33 }
  0x7a   :  { %814 = vmatprep.subr.mxu1 %v999_v33  ;;  %816 = vmatprep.mubr.msk.f32.mxu1 %vm998_vm0, %v999_v33 }
  0x7b   :  { %210 = vmax.xlane.f32.xlu1 %v209_v34 }
  0x7c   :  { %186 = vmax.xlane.f32.xlu0 %v185_v35 }
  0x7f   :  { %155 = vadd.xlane.f32.xlu1 %v154_v40 }
  0x80   :  { %131 = vadd.xlane.f32.xlu0 %v130_v41 }
  0x83   :  { %213 = vmax.xlane.f32.xlu1 %v212_v42 }
  0x84   :  { %189 = vmax.xlane.f32.xlu0 %v188_v43 }
  0x87   :  { %158 = vadd.xlane.f32.xlu1 %v157_v48 }
  0x88   :  { %134 = vadd.xlane.f32.xlu0 %v133_v49 }
  0x8b   :  { %216 = vmax.xlane.f32.xlu1 %v215_v50 }
  0x8c   :  { %192 = vmax.xlane.f32.xlu0 %v191_v51 }
  0x8f   :  { %161 = vadd.xlane.f32.xlu1 %v160_v56 }
  0x90   :  { %137 = vadd.xlane.f32.xlu0 %v136_v57 }
  0x93   :  { %219 = vmax.xlane.f32.xlu1 %v218_v58 }
  0x94   :  { %195 = vmax.xlane.f32.xlu0 %v194_v59 }
  0x97   :  { %222 = vmax.xlane.f32.xlu1 %v221_v60 }
  0x98   :  { %198 = vmax.xlane.f32.xlu0 %v197_v61 }
  0x9b   :  { %225 = vmax.xlane.f32.xlu1 %v224_v62  ;;  %v243_v62 = vlaneseq }
  0x9c   :  { %201 = vmax.xlane.f32.xlu0 %v200_v63 }
  0x9d   :  { %v244_v7 = vand.u32 127, %v243_v62  ;;  %v1234_v10 = vshrl.u32 %v243_v62, 7 }
  0x9f   :  { %v249_v16 = vadd.s32 4294967288, %v244_v7  ;;  %v256_v17 = vadd.s32 4294967280, %v244_v7  ;;  %v263_v23 = vadd.s32 4294967272, %v244_v7  ;;  %v1241_v24 = vsub.s32 %v244_v7, %v1234_v10 }
  0xa0   :  { %v270_v53 = vadd.s32 4294967264, %v244_v7  ;;  %v277_v52 = vadd.s32 4294967256, %v244_v7  ;;  %v284_v44 = vadd.s32 4294967248, %v244_v7 }
  0xa1   :  { %v1244_v26 = vsub.s32 %v249_v16, %v1234_v10  ;;  %v1247_v32 = vsub.s32 %v256_v17, %v1234_v10  ;;  %v1250_v45 = vsub.s32 %v263_v23, %v1234_v10 }
  0xec   :  { %v141_v34 = vpop.xlane.xlu1 %140 }
  0xed   :  { %v117_v35 = vpop.xlane.xlu0 %116  ;;  %v171_v37 = vmul.f32 0.00390625, %v141_v34 }
  0xee   :  { %v163_v19 = vmul.f32 0.00390625, %v117_v35  ;;  %v1262_v35 = vsub.s32 %v277_v52, %v1234_v10 }
  0xf0   :  { %v144_v40 = vpop.xlane.xlu1 %143 }
  0xf1   :  { %v120_v41 = vpop.xlane.xlu0 %119  ;;  %v172_v27 = vmul.f32 0.00390625, %v144_v40  ;;  %v291_v40 = vadd.s32 4294967240, %v244_v7 }
  0xf2   :  { %v164_v62 = vmul.f32 0.00390625, %v120_v41 }
  0xf3   :  { %v305_v17 = vrot.slane %v172_v27, %v1244_v26  ;;  %v1267_v27 = vsub.s32 %v284_v44, %v1234_v10 }
  0xf4   :  { %v147_v42 = vpop.xlane.xlu1 %146  ;;  %v253_v34 = vrot.slane %v164_v62, %v1244_v26 }
  0xf5   :  { %v123_v43 = vpop.xlane.xlu0 %122  ;;  %v173_v36 = vmul.f32 0.00390625, %v147_v42  ;;  %v1259_v42 = vsub.s32 %v270_v53, %v1234_v10  ;;  %v1273_v53 = vsub.s32 %v291_v40, %v1234_v10 }
  0xf6   :  { %v165_v18 = vmul.f32 0.00390625, %v123_v43  ;;  %v301_v43 = vrot.slane %v171_v37, %v1241_v24 }
  0xf8   :  { %v150_v48 = vpop.xlane.xlu1 %149  ;;  %v260_v6 = vrot.slane %v165_v18, %v1247_v32 }
  0xf9   :  { %v126_v49 = vpop.xlane.xlu0 %125  ;;  %v174_v16 = vmul.f32 0.00390625, %v150_v48  ;;  %v310_v48 = vrot.slane %v173_v36, %v1247_v32 }
  0xfa   :  { %v166_v28 = vmul.f32 0.00390625, %v126_v49  ;;  %v248_v49 = vrot.slane %v163_v19, %v1241_v24 }
  0xfb   :  { %v315_v62 = vrot.slane %v174_v16, %v1250_v45 }
  0xfc   :  { %v1222_v50 = vpop.xlane.xlu1 %183  ;;  %v267_v37 = vrot.slane %v166_v28, %v1250_v45  ;;  %v255_v18 = vsel %vm254_vm1, %v253_v34, %v248_v49 }
  0xfd   :  { %v1224_v51 = vpop.xlane.xlu0 %180  ;;  %v363_v36 = vrot.slane %v1222_v50, %v1244_v26 }
  0xfe   :  { %v359_v44 = vrot.slane %v1224_v51, %v1241_v24  ;;  %v262_v51 = vsel %vm261_vm2, %v260_v6, %v255_v18 }
 0x100   :  { %v1226_v56 = vpop.xlane.xlu1 %207 }
 0x101   :  { %v1228_v57 = vpop.xlane.xlu0 %204 }
 0x102   :  { %v398_v16 = vrot.slane %v1228_v57, %v1241_v24  ;;  %v364_v57 = vsel %vm254_vm1, %v363_v36, %v359_v44 }
 0x104   :  { %v153_v58 = vpop.xlane.xlu1 %152 }
 0x105   :  { %v129_v59 = vpop.xlane.xlu0 %128  ;;  %v175_v23 = vmul.f32 0.00390625, %v153_v58  ;;  %v306_v58 = vsel %vm254_vm1, %v305_v17, %v301_v43 }
 0x106   :  { %v167_v7 = vmul.f32 0.00390625, %v129_v59  ;;  %v402_v59 = vrot.slane %v1226_v56, %v1244_v26  ;;  %v311_v28 = vsel %vm261_vm2, %v310_v48, %v306_v58  ;;  %v269_v56 = vsel %vm268_vm3, %v267_v37, %v262_v51 }
 0x107   :  { %v320_v40 = vrot.slane %v175_v23, %v1259_v42  ;;  %v316_v5 = vsel %vm268_vm3, %v315_v62, %v311_v28 }
 0x108   :  { %v1230_v60 = vpop.xlane.xlu1 %210  ;;  %v274_v50 = vrot.slane %v167_v7, %v1259_v42  ;;  %v403_v48 = vsel %vm254_vm1, %v402_v59, %v398_v16 }
 0x109   :  { %v1232_v61 = vpop.xlane.xlu0 %186  ;;  %v407_v24 = vrot.slane %v1230_v60, %v1247_v32 }
 0x10a   :  { %v368_v6 = vrot.slane %v1232_v61, %v1247_v32 }
 0x10b   :  { %v408_v58 = vsel %vm261_vm2, %v407_v24, %v403_v48 }
 0x10c   :  { %v156_v63 = vpop.xlane.xlu1 %155 }
 0x10d   :  { %v132_v3 = vpop.xlane.xlu0 %131  ;;  %v176_v17 = vmul.f32 0.00390625, %v156_v63  ;;  %v321_v63 = vsel %vm275_vm4, %v320_v40, %v316_v5 }
 0x10e   :  { %v168_v43 = vmul.f32 0.00390625, %v132_v3 }
 0x110   :  { %v1236_v11 = vpop.xlane.xlu1 %213  ;;  %v281_v7 = vrot.slane %v168_v43, %v1262_v35 }
 0x111   :  { %v1238_v22 = vpop.xlane.xlu0 %189  ;;  %v412_v60 = vrot.slane %v1236_v11, %v1250_v45 }
 0x112   :  { %v373_v62 = vrot.slane %v1238_v22, %v1250_v45  ;;  %v369_v45 = vsel %vm261_vm2, %v368_v6, %v364_v57 }
 0x113   :  { %v413_v16 = vsel %vm268_vm3, %v412_v60, %v408_v58 }
 0x114   :  { %v159_v25 = vpop.xlane.xlu1 %158 }
 0x115   :  { %v135_v33 = vpop.xlane.xlu0 %134  ;;  %v177_v34 = vmul.f32 0.00390625, %v159_v25  ;;  %v276_v25 = vsel %vm275_vm4, %v274_v50, %v269_v56 }
 0x116   :  { %v169_v49 = vmul.f32 0.00390625, %v135_v33  ;;  %v325_v33 = vrot.slane %v176_v17, %v1262_v35  ;;  %v283_v59 = vsel %vm282_vm5, %v281_v7, %v276_v25  ;;  %v778_v25 = vld [vmem:[#allocation7] ss:$0 sm:$0xff] }
 0x117   :  { %v330_v5 = vrot.slane %v177_v34, %v1267_v27 }
 0x118   :  { %v1252_v29 = vpop.xlane.xlu1 %216 }
 0x119   :  { %v1255_v41 = vpop.xlane.xlu0 %192  ;;  %v417_v61 = vrot.slane %v1252_v29, %v1259_v42  ;;  %v326_v29 = vsel %vm282_vm5, %v325_v33, %v321_v63 }
 0x11a   :  { %v378_v37 = vrot.slane %v1255_v41, %v1259_v42  ;;  %v374_v42 = vsel %vm268_vm3, %v373_v62, %v369_v45  ;;  %v780_v62 = vld [vmem:[#allocation10] ss:$0 sm:$0xff] }
 0x11b   :  { %v418_v28 = vsel %vm275_vm4, %v417_v61, %v413_v16 }
 0x11c   :  { %v162_v52 = vpop.xlane.xlu1 %161 }
 0x11d   :  { %v138_v19 = vpop.xlane.xlu0 %137  ;;  %v178_v26 = vmul.f32 0.00390625, %v162_v52  ;;  %v288_v52 = vrot.slane %v169_v49, %v1267_v27 }
 0x11e   :  { %v170_v3 = vmul.f32 0.00390625, %v138_v19 }
 0x11f   :  { %v335_v36 = vrot.slane %v178_v26, %v1273_v53  ;;  %v290_v40 = vsel %vm289_vm6, %v288_v52, %v283_v59 }
 0x120   :  { %v220_v13 = vpop.xlane.xlu1 %219  ;;  %v295_v22 = vrot.slane %v170_v3, %v1273_v53  ;;  %v529_v3 = vld [vmem:[#allocation8] sm:$0xf] }
 0x121   :  { %v196_v23 = vpop.xlane.xlu0 %195  ;;  %v422_v11 = vrot.slane %v220_v13, %v1262_v35  ;;  %v331_v13 = vsel %vm289_vm6, %v330_v5, %v326_v29  ;;  %815 = vmatpush3.msk.msra.mxu1 %vm541_vm12, %v529_v3 }
 0x122   :  { %v383_v19 = vrot.slane %v196_v23, %v1262_v35  ;;  %v379_v35 = vsel %vm275_vm4, %v378_v37, %v374_v42  ;;  %v336_v17 = vsel %vm296_vm7, %v335_v36, %v331_v13 }
 0x123   :  { %v423_v43 = vsel %vm282_vm5, %v422_v11, %v418_v28 }
 0x124   :  { %v223_v32 = vpop.xlane.xlu1 %222  ;;  %v384_v49 = vsel %vm282_vm5, %v383_v19, %v379_v35  ;;  %v662_v19 = vsub.s32 1, %v1234_v10 }
 0x125   :  { %v199_v44 = vpop.xlane.xlu0 %198  ;;  %v427_v18 = vrot.slane %v223_v32, %v1267_v27 }
 0x126   :  { %v388_v41 = vrot.slane %v199_v44, %v1267_v27  ;;  %v297_v27 = vsel %vm296_vm7, %v295_v22, %v290_v40  ;;  %v627_v44 = vsub.s32 0, %v1234_v10 }
 0x127   :  { %v428_v56 = vsel %vm289_vm6, %v427_v18, %v423_v43  ;;  %v338_v48 = vsel %vm337_vm8, %v336_v17, %v297_v27 }
 0x128   :  { %v226_v50 = vpop.xlane.xlu1 %225  ;;  %v389_v24 = vsel %vm289_vm6, %v388_v41, %v384_v49 }
 0x129   :  { %v432_v51 = vrot.slane %v226_v50, %v1273_v53  ;;  %v202_v34 = vpop.xlane.xlu0 %201 }
 0x12a   :  { %v393_v57 = vrot.slane %v202_v34, %v1273_v53 }
 0x12b   :  { %v433_v26 = vsel %vm296_vm7, %v432_v51, %v428_v56  ;;  %v1421_v56 = vld [vmem:[#allocation18_spill] sm:$0xff] }
 0x12c   :  { %v394_v23 = vsel %vm296_vm7, %v393_v57, %v389_v24  ;;  %v1423_v24 = vld [vmem:[#allocation17_spill] sm:$0xff] }
 0x12d   :  { %v435_v63 = vsel %vm434_vm9, %v433_v26, %v394_v23  ;;  %v1424_v23 = vld [vmem:[#allocation21_spill] sm:$0xff] }
 0x12e   :  { %v438_v6 = vsel %vm437_vm10, %v338_v48, %v435_v63  ;;  %v1425_v63 = vld [vmem:[#allocation22_spill] sm:$0xff] }
 0x12f   :  { %812 = vmatmul.mubr.msk.f32.vlgmr.msra.gmra.mrb[0].mxu0 %vm454_vm11, %v438_v6  ;;  %v1426_v6 = vld [vmem:[#allocation19_spill] sm:$0xff] }
 0x202   :  { %v524_v33 = vpop.f32.mrb[0].mxu0 }
 0x203   :  { %v525_v53 = vadd.f32 %v778_v25, %v524_v33  ;;  %v813_v7 = vpop.f32.mrb[1].mxu0  ;;  %v1427_v25 = vld [vmem:[#allocation20_spill] sm:$0xff] }
 0x205   :  { %v528_v60 = vmax.f32 %v525_v53, 0.0  ;;  %v1428_v53 = vld [vmem:[#allocation25_spill] sm:$0xff] }
 0x207   :  { %817 = vmatmul.mubr.msk.f32.vlgmr.msra.gmra.mrb[0].mxu1 %vm537_vm13, %v528_v60  ;;  %v1429_v60 = vld [vmem:[#allocation26_spill] sm:$0xff] }
 0x2da   :  { %v611_v5 = vpop.f32.mrb[0].mxu1 }
 0x2db   :  { %v612_v52 = vadd.f32 %v780_v62, %v611_v5  ;;  %v818_v61 = vpop.f32.mrb[1].mxu1 }
 0x2dd   :  { %v616_v32 = vrot.slane %v612_v52, 2 }
 0x2df   :  { %v618_v58 = vadd.f32 %v616_v32, %v612_v52  ;;  %v1430_v52 = vld [vmem:[#allocation23_spill] sm:$0xff]  ;;  %v1431_v32 = vld [vmem:[#allocation24_spill] sm:$0xff] }
 0x2e1   :  { %v783_v37 = vmul.f32 -1.442695, %v618_v58 }
 0x2e3   :  { %844 = vpow2.f32 %v783_v37 }
 0x2ed   :  { %v845_v36 = vpop.eup %844 }
 0x2ee   :  { %v622_v11 = vadd.f32 1.0, %v845_v36  ;;  %v1432_v36 = vld [vmem:[#allocation27_spill] sm:$0xff] }
 0x2f0   :  { %846 = vrcp.f32 %v622_v11 }
 0x2fa   :  { %v847_v45 = vpop.eup %846 }
 0x2fb   :  { %v628_v22 = vrot.slane %v847_v45, %v627_v44  ;;  %v663_v18 = vrot.slane %v847_v45, %v662_v19  ;;  %v1433_v44 = vld [vmem:[#allocation28_spill] sm:$0xff] }
 0x2fd   :  { %634 = vbcast.lane.b32.xlu1 %v628_v22, 264  ;;  %630 = vbcast.lane.b32.xlu0 %v628_v22, 256 }
 0x301   :  { %638 = vbcast.lane.b32.xlu1 %v628_v22, 272  ;;  %646 = vbcast.lane.b32.xlu0 %v628_v22, 288 }
 0x305   :  { %642 = vbcast.lane.b32.xlu1 %v628_v22, 280  ;;  %654 = vbcast.lane.b32.xlu0 %v628_v22, 304 }
 0x309   :  { %650 = vbcast.lane.b32.xlu1 %v628_v22, 296  ;;  %665 = vbcast.lane.b32.xlu0 %v663_v18, 256 }
 0x30d   :  { %658 = vbcast.lane.b32.xlu1 %v628_v22, 312  ;;  %673 = vbcast.lane.b32.xlu0 %v663_v18, 272 }
 0x311   :  { %669 = vbcast.lane.b32.xlu1 %v663_v18, 264  ;;  %681 = vbcast.lane.b32.xlu0 %v663_v18, 288 }
 0x315   :  { %677 = vbcast.lane.b32.xlu1 %v663_v18, 280  ;;  %689 = vbcast.lane.b32.xlu0 %v663_v18, 304 }
 0x319   :  { %685 = vbcast.lane.b32.xlu1 %v663_v18, 296 }
 0x31d   :  { %693 = vbcast.lane.b32.xlu1 %v663_v18, 312 }
 0x36f   :  { %v635_v29 = vpop.permute.xlu1 %634  ;;  %v631_v59 = vpop.permute.xlu0 %630 }
 0x370   :  { %v697_v16 = vmul.f32 %v635_v29, %v1110_v8  ;;  %v698_v41 = vmul.f32 %v635_v29, %v1112_v9  ;;  %v695_v10 = vmul.f32 %v631_v59, %v1098_v2  ;;  %v696_v42 = vmul.f32 %v631_v59, %v1102_v4 }
 0x372   :  { %729 = vst [vmem:[#allocation11 + $0x10] sm:$0xff] %v697_v16  ;;  %730 = vst [vmem:[#allocation11 + $0x18] sm:$0xff] %v698_v41 }
 0x373   :  { %727 = vst [vmem:[#allocation11] sm:$0xff] %v695_v10  ;;  %728 = vst [vmem:[#allocation11 + $0x8] sm:$0xff] %v696_v42  ;;  %v639_v13 = vpop.permute.xlu1 %638  ;;  %v647_v40 = vpop.permute.xlu0 %646 }
 0x374   :  { %v699_v28 = vmul.f32 %v639_v13, %v1122_v14  ;;  %v700_v50 = vmul.f32 %v639_v13, %v1124_v15  ;;  %v703_v35 = vmul.f32 %v647_v40, %v1154_v30  ;;  %v704_v8 = vmul.f32 %v647_v40, %v1156_v31 }
 0x376   :  { %731 = vst [vmem:[#allocation11 + $0x20] sm:$0xff] %v699_v28  ;;  %732 = vst [vmem:[#allocation11 + $0x28] sm:$0xff] %v700_v50 }
 0x377   :  { %735 = vst [vmem:[#allocation11 + $0x40] sm:$0xff] %v703_v35  ;;  %736 = vst [vmem:[#allocation11 + $0x48] sm:$0xff] %v704_v8  ;;  %v643_v2 = vpop.permute.xlu1 %642  ;;  %v655_v4 = vpop.permute.xlu0 %654 }
 0x378   :  { %v701_v9 = vmul.f32 %v643_v2, %v1134_v20  ;;  %v702_v17 = vmul.f32 %v643_v2, %v1136_v21  ;;  %v707_v43 = vmul.f32 %v655_v4, %v1186_v46  ;;  %v708_v14 = vmul.f32 %v655_v4, %v1188_v47 }
 0x37a   :  { %733 = vst [vmem:[#allocation11 + $0x30] sm:$0xff] %v701_v9  ;;  %734 = vst [vmem:[#allocation11 + $0x38] sm:$0xff] %v702_v17 }
 0x37b   :  { %739 = vst [vmem:[#allocation11 + $0x60] sm:$0xff] %v707_v43  ;;  %740 = vst [vmem:[#allocation11 + $0x68] sm:$0xff] %v708_v14  ;;  %v651_v15 = vpop.permute.xlu1 %650  ;;  %v666_v30 = vpop.permute.xlu0 %665 }
 0x37c   :  { %v705_v31 = vmul.f32 %v651_v15, %v1170_v38  ;;  %v706_v51 = vmul.f32 %v651_v15, %v1172_v39  ;;  %v711_v34 = vmul.f32 %v666_v30, %v1094_v0  ;;  %v712_v20 = vmul.f32 %v666_v30, %v1096_v1  ;;  %v1422_v39 = vld [vmem:[#allocation16_spill] sm:$0xff] }
 0x37e   :  { %737 = vst [vmem:[#allocation11 + $0x50] sm:$0xff] %v705_v31  ;;  %738 = vst [vmem:[#allocation11 + $0x58] sm:$0xff] %v706_v51 }
 0x37f   :  { %743 = vst [vmem:[#allocation11 + $0x80] sm:$0xff] %v711_v34  ;;  %744 = vst [vmem:[#allocation11 + $0x88] sm:$0xff] %v712_v20  ;;  %v659_v21 = vpop.permute.xlu1 %658  ;;  %v674_v46 = vpop.permute.xlu0 %673 }
 0x380   :  { %v709_v47 = vmul.f32 %v659_v21, %v1202_v54  ;;  %v710_v27 = vmul.f32 %v659_v21, %v1204_v55  ;;  %v715_v49 = vmul.f32 %v674_v46, %v1118_v12  ;;  %v716_v38 = vmul.f32 %v674_v46, %v1421_v56 }
 0x382   :  { %741 = vst [vmem:[#allocation11 + $0x70] sm:$0xff] %v709_v47  ;;  %742 = vst [vmem:[#allocation11 + $0x78] sm:$0xff] %v710_v27 }
 0x383   :  { %747 = vst [vmem:[#allocation11 + $0xa0] sm:$0xff] %v715_v49  ;;  %748 = vst [vmem:[#allocation11 + $0xa8] sm:$0xff] %v716_v38  ;;  %v670_v0 = vpop.permute.xlu1 %669  ;;  %v682_v1 = vpop.permute.xlu0 %681 }
 0x384   :  { %v713_v57 = vmul.f32 %v670_v0, %v1422_v39  ;;  %v714_v26 = vmul.f32 %v670_v0, %v1423_v24  ;;  %v719_v48 = vmul.f32 %v682_v1, %v1424_v23  ;;  %v720_v54 = vmul.f32 %v682_v1, %v1425_v63 }
 0x386   :  { %745 = vst [vmem:[#allocation11 + $0x90] sm:$0xff] %v713_v57  ;;  %746 = vst [vmem:[#allocation11 + $0x98] sm:$0xff] %v714_v26 }
 0x387   :  { %751 = vst [vmem:[#allocation11 + $0xc0] sm:$0xff] %v719_v48  ;;  %752 = vst [vmem:[#allocation11 + $0xc8] sm:$0xff] %v720_v54  ;;  %v678_v12 = vpop.permute.xlu1 %677  ;;  %v690_v55 = vpop.permute.xlu0 %689 }
 0x388   :  { %v717_v3 = vmul.f32 %v678_v12, %v1426_v6  ;;  %v718_v33 = vmul.f32 %v678_v12, %v1427_v25  ;;  %v723_v7 = vmul.f32 %v690_v55, %v1428_v53  ;;  %v724_v62 = vmul.f32 %v690_v55, %v1429_v60 }
 0x38a   :  { %749 = vst [vmem:[#allocation11 + $0xb0] sm:$0xff] %v717_v3  ;;  %750 = vst [vmem:[#allocation11 + $0xb8] sm:$0xff] %v718_v33 }
 0x38b   :  { %755 = vst [vmem:[#allocation11 + $0xe0] sm:$0xff] %v723_v7  ;;  %756 = vst [vmem:[#allocation11 + $0xe8] sm:$0xff] %v724_v62  ;;  %v686_v5 = vpop.permute.xlu1 %685 }
 0x38c   :  { %v721_v61 = vmul.f32 %v686_v5, %v1430_v52  ;;  %v722_v58 = vmul.f32 %v686_v5, %v1431_v32 }
 0x38e   :  { %753 = vst [vmem:[#allocation11 + $0xd0] sm:$0xff] %v721_v61  ;;  %754 = vst [vmem:[#allocation11 + $0xd8] sm:$0xff] %v722_v58 }
 0x38f   :  { %v694_v37 = vpop.permute.xlu1 %693 }
 0x390   :  { %v725_v11 = vmul.f32 %v694_v37, %v1432_v36  ;;  %v726_v45 = vmul.f32 %v694_v37, %v1433_v44 }
 0x392   :  { %757 = vst [vmem:[#allocation11 + $0xf0] sm:$0xff] %v725_v11  ;;  %758 = vst [vmem:[#allocation11 + $0xf8] sm:$0xff] %v726_v45 }
 0x393   :  { %969 = shalt.err (!%p966_p2)
}
 0x394   :  { %s970_s9 = scalar_lea.hbm %s1394_s5, 4096 }
 0x395   :  { %p971_p3 = scmp.ne.s32.totalorder %s1394_s5, %s970_s9  ;;  %p974_p4 = scmp.lt.u32.totalorder %s970_s9, %s1394_s5 }
 0x397   :  { %p976_p5 = pnand %p974_p4, %p971_p3 }
 0x399   :  { %979 = shalt.err (!%p976_p5)
}
 0x39a   :  { %770 = dma.vmem_to_hbm [thread:$0]  %s765_s30, 4096, %s1394_s5, [#allocation4], %s993_s3, %s993_s3, %s994_s28  }
 0x39b   :  { %986 = dma.done.wait [#allocation4], 4096  }
 0x39c   :  { %987 = vsyncadd [#allocation4], 4294963200 }
 0x39d   :  { %774 = vsyncpa [#allocation3], 1 }
 0x39e   :  { %775 = vsyncpa [#allocation6], 1 }
 0x39f   :  { %776 = vsyncpa [#allocation9], 1 }
 0x3a0   :  { %777 = vsyncpa [#allocation4], 1 }

</bundles_post_ra>
